<compile_context>
chip_gen: v5e
topology: v5e:2x2
jax: 0.10.0
libtpu: 0.0.40
codegen_flags: <defaults>
</compile_context>

<pallas_src>
import functools

import jax
import jax.numpy as jnp
from jax import lax
from jax.experimental import pallas as pl
from jax.experimental.pallas import tpu as pltpu

FOCAL_ALPHA = 0.25   # gamma == 2 implemented as an explicit square below
NCORES = 2           # leading "parallel" grid axis (v7x megacore; harmless on v5e/v6e)


def _make_kernel(tile, m_valid, blocks_per_core, num_classes):
    def kernel(side_ref, cls_p_ref, out_ref,
               acc_np_ref, acc_loc_ref, acc_ctn_ref, acc_cls_ref):
        p = pl.program_id(0)
        i = pl.program_id(1)

        @pl.when(i == 0)
        def _():
            acc_np_ref[...] = jnp.zeros_like(acc_np_ref)
            acc_loc_ref[...] = jnp.zeros_like(acc_loc_ref)
            acc_ctn_ref[...] = jnp.zeros_like(acc_ctn_ref)
            acc_cls_ref[...] = jnp.zeros_like(acc_cls_ref)

        # Validity of each lane (handles the zero-padded tail of the M axis).
        blk = p * blocks_per_core + i
        lane = lax.broadcasted_iota(jnp.int32, (1, tile), 1)
        valid = (blk * tile + lane) < m_valid                    # (1, tile) bool

        side = side_ref[...].astype(jnp.float32)                 # (11, tile)
        loc_p = jnp.exp(side[0:4, :])                            # loc_p.exp()
        loc_t = side[4:8, :]
        ctn_p = side[8:9, :]
        ctn_t = side[9:10, :]
        cls_t_f = side[10:11, :]                                 # class id as f32
        cls_t_i = cls_t_f.astype(jnp.int32)

        pos = jnp.logical_and(cls_t_f != 0.0, valid)             # (1, tile) bool
        acc_np_ref[...] += pos.astype(jnp.float32)

        # ---------------- IoU (UnitBox) loss on positive anchors --------------
        area_p = (loc_p[0:1] + loc_p[2:3]) * (loc_p[1:2] + loc_p[3:4])
        area_t = (loc_t[0:1] + loc_t[2:3]) * (loc_t[1:2] + loc_t[3:4])
        w_i = (jnp.minimum(loc_p[0:1], loc_t[0:1])
               + jnp.minimum(loc_p[2:3], loc_t[2:3]))
        h_i = (jnp.minimum(loc_p[1:2], loc_t[1:2])
               + jnp.minimum(loc_p[3:4], loc_t[3:4]))
        area_i = w_i * h_i
        iou = area_i / (area_p + area_t - area_i)
        iou_safe = jnp.where(pos, iou, 1.0)      # -log(1) == 0 on non-positive lanes
        acc_loc_ref[...] += -jnp.log(iou_safe)

        # ---------------- sigmoid focal loss over all (valid) anchors ---------
        x = cls_p_ref[...].astype(jnp.float32)                   # (C, tile)
        cls_idx = lax.broadcasted_iota(jnp.int32, (num_classes, tile), 0)
        t = (cls_idx == cls_t_i).astype(jnp.float32)             # one_hot(cls_t, C)
        z = (2.0 * t - 1.0) * x
        e = jnp.exp(-jnp.abs(z))
        bce = jnp.maximum(-z, 0.0) + jnp.log1p(e)                # BCE with logits
        one_m_pt = jnp.where(z >= 0.0, e, 1.0) / (1.0 + e)       # 1 - pt = sigmoid(-z)
        alpha_t = FOCAL_ALPHA * t + (1.0 - FOCAL_ALPHA) * (1.0 - t)
        focal = alpha_t * (one_m_pt * one_m_pt) * bce            # gamma == 2
        acc_cls_ref[...] += jnp.where(valid, focal, 0.0)

        # ---------------- centerness BCE-with-logits on positives -------------
        ctn_bce = (jnp.maximum(ctn_p, 0.0) - ctn_p * ctn_t
                   + jnp.log1p(jnp.exp(-jnp.abs(ctn_p))))
        acc_ctn_ref[...] += jnp.where(pos, ctn_bce, 0.0)

        # ---------------- deferred cross-lane reductions (last step only) -----
        @pl.when(i == blocks_per_core - 1)
        def _():
            num_pos = jnp.sum(acc_np_ref[...], keepdims=True)    # (1, 1)
            loc_sum = jnp.sum(acc_loc_ref[...], keepdims=True)
            cls_sum = jnp.sum(acc_cls_ref[...], keepdims=True)
            ctn_sum = jnp.sum(acc_ctn_ref[...], keepdims=True)
            out_ref[...] = jnp.concatenate(
                [num_pos, loc_sum, cls_sum, ctn_sum], axis=1).reshape(1, 1, 4)

    return kernel


def _run_kernel(side, cls_p_t, tile, m_valid, blocks_per_core, num_classes):
    kernel = _make_kernel(tile, m_valid, blocks_per_core, num_classes)
    col = lambda p, i: (0, p * blocks_per_core + i)
    return pl.pallas_call(
        kernel,
        out_shape=jax.ShapeDtypeStruct((NCORES, 1, 4), jnp.float32),
        grid_spec=pltpu.PrefetchScalarGridSpec(
            num_scalar_prefetch=0,
            grid=(NCORES, blocks_per_core),
            in_specs=[pl.BlockSpec((11, tile), col),           # packed side feats
                      pl.BlockSpec((num_classes, tile), col)], # class logits
            out_specs=pl.BlockSpec((1, 1, 4), lambda p, i: (p, 0, 0)),
            scratch_shapes=[pltpu.VMEM((1, tile), jnp.float32),            # num_pos
                            pltpu.VMEM((1, tile), jnp.float32),            # loc
                            pltpu.VMEM((1, tile), jnp.float32),            # ctn
                            pltpu.VMEM((num_classes, tile), jnp.float32)]  # cls
        ),
        compiler_params=pltpu.CompilerParams(
            dimension_semantics=("parallel", "arbitrary"),
            vmem_limit_bytes=32 * 1024 * 1024),
    )(side, cls_p_t)


@functools.partial(jax.jit, static_argnames=("use_ctn", "tile_max"))
def fcos_loss(loc_p, cls_p, ctn_p, loc_t, cls_t, ctn_t,
              use_ctn=True, tile_max=8192):
    """JAX/Pallas equivalent of FCOSLoss.forward.

    loc_p, loc_t : (B, N, 4); cls_p : (B, N, C); cls_t : (B, N) int;
    ctn_p, ctn_t : (B, N).
    """
    b, n, c = cls_p.shape
    m = b * n

    # Lane-dense layout: features on sublanes, anchors (M) on lanes.
    side = jnp.concatenate([
        jnp.transpose(loc_p.reshape(m, 4)).astype(jnp.float32),
        jnp.transpose(loc_t.reshape(m, 4)).astype(jnp.float32),
        ctn_p.reshape(1, m).astype(jnp.float32),
        ctn_t.reshape(1, m).astype(jnp.float32),
        cls_t.reshape(1, m).astype(jnp.float32),   # small class ids are exact in f32
    ], axis=0)                                     # (11, M)
    cls_p_t = jnp.transpose(cls_p.reshape(m, c))   # (C, M), native dtype (cast in-kernel)

    # Large lane tile amortizes the per-grid-step fixed cost; clamp to data size.
    tile = max(128, min(int(tile_max), pl.next_power_of_2(m)))
    nblocks = pl.cdiv(m, tile)
    nblocks = pl.cdiv(nblocks, NCORES) * NCORES    # at least one block per core
    blocks_per_core = nblocks // NCORES
    mp = nblocks * tile
    pad = mp - m
    if pad:                                        # zero tail; masked in-kernel
        side = jnp.pad(side, ((0, 0), (0, pad)))
        cls_p_t = jnp.pad(cls_p_t, ((0, 0), (0, pad)))

    out = _run_kernel(side, cls_p_t, tile, m, blocks_per_core, c)  # (NCORES, 1, 4)
    sums = jnp.sum(out[:, 0, :], axis=0)                           # (4,)
    num_pos = sums[0]
    total = sums[1] + sums[2]
    if use_ctn:
        total = total + sums[3]
    # num_pos == 0 -> loss 0 (mirrors the early return in the PyTorch module)
    return jnp.where(num_pos > 0.0, total / jnp.maximum(num_pos, 1.0), 0.0)


def _reference_loss(loc_p, cls_p, ctn_p, loc_t, cls_t, ctn_t, use_ctn=True):
    """Pure-JAX mirror of FCOSLoss.forward (for correctness checking)."""
    c = cls_p.shape[-1]
    lp = jnp.exp(loc_p.astype(jnp.float32)).reshape(-1, 4)
    lt = loc_t.astype(jnp.float32).reshape(-1, 4)
    x = cls_p.astype(jnp.float32).reshape(-1, c)
    ct = cls_t.reshape(-1)
    cp = ctn_p.astype(jnp.float32).reshape(-1)
    ctt = ctn_t.astype(jnp.float32).reshape(-1)

    pos = ct != 0
    num_pos = jnp.sum(pos.astype(jnp.float32))

    area_p = (lp[:, 0] + lp[:, 2]) * (lp[:, 1] + lp[:, 3])
    area_t = (lt[:, 0] + lt[:, 2]) * (lt[:, 1] + lt[:, 3])
    w_i = jnp.minimum(lp[:, 0], lt[:, 0]) + jnp.minimum(lp[:, 2], lt[:, 2])
    h_i = jnp.minimum(lp[:, 1], lt[:, 1]) + jnp.minimum(lp[:, 3], lt[:, 3])
    area_i = w_i * h_i
    iou = area_i / (area_p + area_t - area_i)
    loc_loss = jnp.sum(jnp.where(pos, -jnp.log(iou), 0.0))

    t = jax.nn.one_hot(ct, c, dtype=jnp.float32)
    p = jax.nn.sigmoid(x)
    pt = p * t + (1.0 - p) * (1.0 - t)
    bce = jnp.maximum(x, 0.0) - x * t + jnp.log1p(jnp.exp(-jnp.abs(x)))
    alpha_t = FOCAL_ALPHA * t + (1.0 - FOCAL_ALPHA) * (1.0 - t)
    cls_loss = jnp.sum(alpha_t * (1.0 - pt) ** 2 * bce)

    ctn_bce = jnp.maximum(cp, 0.0) - cp * ctt + jnp.log1p(jnp.exp(-jnp.abs(cp)))
    ctn_loss = jnp.sum(jnp.where(pos, ctn_bce, 0.0))

    total = loc_loss + cls_loss + (ctn_loss if use_ctn else 0.0)
    return jnp.where(num_pos > 0, total / jnp.maximum(num_pos, 1.0), 0.0)


if __name__ == "__main__":
    B, N, C = 2, 256, 8  # C = number of classes incl. background at index 0
    key = jax.random.PRNGKey(0)
    k1, k2, k3, k4, k5, k6 = jax.random.split(key, 6)

    loc_p = jax.random.normal(k1, (B, N, 4), jnp.float32) * 0.5
    cls_p = jax.random.normal(k2, (B, N, C), jnp.float32)
    ctn_p = jax.random.normal(k3, (B, N), jnp.float32)
    loc_t = jax.random.uniform(k4, (B, N, 4), jnp.float32,
                               minval=0.5, maxval=4.0)
    cls_t = jax.random.randint(k5, (B, N), 0, C)           # 0 = background
    ctn_t = jax.random.uniform(k6, (B, N), jnp.float32)

    loss = fcos_loss(loc_p, cls_p, ctn_p, loc_t, cls_t, ctn_t, use_ctn=True)
    loss = jax.block_until_ready(loss)
    assert jnp.isfinite(loss), f"non-finite loss: {loss}"

    ref = _reference_loss(loc_p, cls_p, ctn_p, loc_t, cls_t, ctn_t, use_ctn=True)
    assert jnp.allclose(loss, ref, rtol=1e-3, atol=1e-5), (loss, ref)

    print("KERNEL_OK")
</pallas_src>

<mosaic_0001>
module attributes {stable_mosaic.version = 11 : i64} {
  func.func @kernel(%arg0: i32, %arg1: i32, %arg2: memref<11x512xf32, #tpu.memory_space<vmem>>, %arg3: memref<8x512xf32, #tpu.memory_space<vmem>>, %arg4: memref<1x1x4xf32, #tpu.memory_space<vmem>>, %arg5: memref<1x512xf32, #tpu.memory_space<vmem>>, %arg6: memref<1x512xf32, #tpu.memory_space<vmem>>, %arg7: memref<1x512xf32, #tpu.memory_space<vmem>>, %arg8: memref<8x512xf32, #tpu.memory_space<vmem>>) attributes {dimension_semantics = [#tpu.dimension_semantics<parallel>, #tpu.dimension_semantics<arbitrary>], iteration_bounds = array<i64: 2, 1>, scalar_prefetch = 0 : i64, scratch_operands = 4 : i64, tpu.core_type = #tpu.core_type<tc>, window_params = [{transform_indices = @transform_0, window_bounds = array<i64: 11, 512>}, {transform_indices = @transform_1, window_bounds = array<i64: 8, 512>}, {transform_indices = @transform_2, window_bounds = array<i64: 1, 1, 4>}]} {
    %c0_i32 = arith.constant 0 : i32
    %0 = arith.cmpi eq, %arg1, %c0_i32 : i32
    %1 = arith.extui %0 : i1 to i32
    %c0_i32_0 = arith.constant 0 : i32
    %2 = arith.cmpi ne, %1, %c0_i32_0 : i32
    scf.if %2 {
      %cst_40 = arith.constant 0.000000e+00 : f32
      %130 = vector.broadcast %cst_40 : f32 to vector<1x512xf32>
      %c0_41 = arith.constant 0 : index
      %c0_42 = arith.constant 0 : index
      %131 = vector.load %arg5[%c0_41, %c0_42] : memref<1x512xf32, #tpu.memory_space<vmem>>, vector<1x512xf32>
      tpu.vector_store %arg5[%c0_41, %c0_42], %130 {strides = array<i32>} : memref<1x512xf32, #tpu.memory_space<vmem>>, vector<1x512xf32>,
      %cst_43 = arith.constant 0.000000e+00 : f32
      %132 = vector.broadcast %cst_43 : f32 to vector<1x512xf32>
      %c0_44 = arith.constant 0 : index
      %c0_45 = arith.constant 0 : index
      %133 = vector.load %arg6[%c0_44, %c0_45] : memref<1x512xf32, #tpu.memory_space<vmem>>, vector<1x512xf32>
      tpu.vector_store %arg6[%c0_44, %c0_45], %132 {strides = array<i32>} : memref<1x512xf32, #tpu.memory_space<vmem>>, vector<1x512xf32>,
      %cst_46 = arith.constant 0.000000e+00 : f32
      %134 = vector.broadcast %cst_46 : f32 to vector<1x512xf32>
      %c0_47 = arith.constant 0 : index
      %c0_48 = arith.constant 0 : index
      %135 = vector.load %arg7[%c0_47, %c0_48] : memref<1x512xf32, #tpu.memory_space<vmem>>, vector<1x512xf32>
      tpu.vector_store %arg7[%c0_47, %c0_48], %134 {strides = array<i32>} : memref<1x512xf32, #tpu.memory_space<vmem>>, vector<1x512xf32>,
      %cst_49 = arith.constant 0.000000e+00 : f32
      %136 = vector.broadcast %cst_49 : f32 to vector<8x512xf32>
      %c0_50 = arith.constant 0 : index
      %c0_51 = arith.constant 0 : index
      %137 = vector.load %arg8[%c0_50, %c0_51] : memref<8x512xf32, #tpu.memory_space<vmem>>, vector<8x512xf32>
      tpu.vector_store %arg8[%c0_50, %c0_51], %136 {strides = array<i32>} : memref<8x512xf32, #tpu.memory_space<vmem>>, vector<8x512xf32>,
    } else {
    }
    %c1_i32 = arith.constant 1 : i32
    %3 = arith.muli %arg0, %c1_i32 : i32
    %4 = arith.addi %3, %arg1 : i32
    %5 = tpu.iota {dimensions = array<i32: 1>} : vector<1x512xi32>
    %c512_i32 = arith.constant 512 : i32
    %6 = arith.muli %4, %c512_i32 : i32
    %7 = vector.broadcast %6 : i32 to vector<1x512xi32>
    %8 = arith.addi %7, %5 : vector<1x512xi32>
    %c512_i32_1 = arith.constant 512 : i32
    %9 = vector.broadcast %c512_i32_1 : i32 to vector<1x512xi32>
    %10 = arith.cmpi slt, %8, %9 : vector<1x512xi32>
    %c0 = arith.constant 0 : index
    %c0_2 = arith.constant 0 : index
    %11 = vector.load %arg2[%c0, %c0_2] : memref<11x512xf32, #tpu.memory_space<vmem>>, vector<11x512xf32>
    %12 = vector.extract_strided_slice %11 {offsets = [0, 0], sizes = [4, 512], strides = [1, 1]} : vector<11x512xf32> to vector<4x512xf32>
    %13 = math.exp %12 : vector<4x512xf32>
    %14 = vector.extract_strided_slice %11 {offsets = [4, 0], sizes = [4, 512], strides = [1, 1]} : vector<11x512xf32> to vector<4x512xf32>
    %15 = vector.extract_strided_slice %11 {offsets = [8, 0], sizes = [1, 512], strides = [1, 1]} : vector<11x512xf32> to vector<1x512xf32>
    %16 = vector.extract_strided_slice %11 {offsets = [9, 0], sizes = [1, 512], strides = [1, 1]} : vector<11x512xf32> to vector<1x512xf32>
    %17 = vector.extract_strided_slice %11 {offsets = [10, 0], sizes = [1, 512], strides = [1, 1]} : vector<11x512xf32> to vector<1x512xf32>
    %18 = arith.fptosi %17 : vector<1x512xf32> to vector<1x512xi32>
    %cst = arith.constant 0.000000e+00 : f32
    %19 = vector.broadcast %cst : f32 to vector<1x512xf32>
    %20 = arith.cmpf one, %17, %19 : vector<1x512xf32>
    %21 = arith.andi %20, %10 : vector<1x512xi1>
    %c0_3 = arith.constant 0 : index
    %c0_4 = arith.constant 0 : index
    %22 = vector.load %arg5[%c0_3, %c0_4] : memref<1x512xf32, #tpu.memory_space<vmem>>, vector<1x512xf32>
    %23 = arith.extui %21 : vector<1x512xi1> to vector<1x512xi32>
    %24 = arith.sitofp %23 : vector<1x512xi32> to vector<1x512xf32>
    %25 = arith.addf %22, %24 : vector<1x512xf32>
    %c0_5 = arith.constant 0 : index
    %c0_6 = arith.constant 0 : index
    %26 = vector.load %arg5[%c0_5, %c0_6] : memref<1x512xf32, #tpu.memory_space<vmem>>, vector<1x512xf32>
    tpu.vector_store %arg5[%c0_5, %c0_6], %25 {strides = array<i32>} : memref<1x512xf32, #tpu.memory_space<vmem>>, vector<1x512xf32>,
    %27 = vector.extract_strided_slice %13 {offsets = [0, 0], sizes = [1, 512], strides = [1, 1]} : vector<4x512xf32> to vector<1x512xf32>
    %28 = vector.extract_strided_slice %13 {offsets = [2, 0], sizes = [1, 512], strides = [1, 1]} : vector<4x512xf32> to vector<1x512xf32>
    %29 = arith.addf %27, %28 : vector<1x512xf32>
    %30 = vector.extract_strided_slice %13 {offsets = [1, 0], sizes = [1, 512], strides = [1, 1]} : vector<4x512xf32> to vector<1x512xf32>
    %31 = vector.extract_strided_slice %13 {offsets = [3, 0], sizes = [1, 512], strides = [1, 1]} : vector<4x512xf32> to vector<1x512xf32>
    %32 = arith.addf %30, %31 : vector<1x512xf32>
    %33 = arith.mulf %29, %32 : vector<1x512xf32>
    %34 = vector.extract_strided_slice %14 {offsets = [0, 0], sizes = [1, 512], strides = [1, 1]} : vector<4x512xf32> to vector<1x512xf32>
    %35 = vector.extract_strided_slice %14 {offsets = [2, 0], sizes = [1, 512], strides = [1, 1]} : vector<4x512xf32> to vector<1x512xf32>
    %36 = arith.addf %34, %35 : vector<1x512xf32>
    %37 = vector.extract_strided_slice %14 {offsets = [1, 0], sizes = [1, 512], strides = [1, 1]} : vector<4x512xf32> to vector<1x512xf32>
    %38 = vector.extract_strided_slice %14 {offsets = [3, 0], sizes = [1, 512], strides = [1, 1]} : vector<4x512xf32> to vector<1x512xf32>
    %39 = arith.addf %37, %38 : vector<1x512xf32>
    %40 = arith.mulf %36, %39 : vector<1x512xf32>
    %41 = vector.extract_strided_slice %13 {offsets = [0, 0], sizes = [1, 512], strides = [1, 1]} : vector<4x512xf32> to vector<1x512xf32>
    %42 = vector.extract_strided_slice %14 {offsets = [0, 0], sizes = [1, 512], strides = [1, 1]} : vector<4x512xf32> to vector<1x512xf32>
    %43 = arith.minimumf %41, %42 : vector<1x512xf32>
    %44 = vector.extract_strided_slice %13 {offsets = [2, 0], sizes = [1, 512], strides = [1, 1]} : vector<4x512xf32> to vector<1x512xf32>
    %45 = vector.extract_strided_slice %14 {offsets = [2, 0], sizes = [1, 512], strides = [1, 1]} : vector<4x512xf32> to vector<1x512xf32>
    %46 = arith.minimumf %44, %45 : vector<1x512xf32>
    %47 = arith.addf %43, %46 : vector<1x512xf32>
    %48 = vector.extract_strided_slice %13 {offsets = [1, 0], sizes = [1, 512], strides = [1, 1]} : vector<4x512xf32> to vector<1x512xf32>
    %49 = vector.extract_strided_slice %14 {offsets = [1, 0], sizes = [1, 512], strides = [1, 1]} : vector<4x512xf32> to vector<1x512xf32>
    %50 = arith.minimumf %48, %49 : vector<1x512xf32>
    %51 = vector.extract_strided_slice %13 {offsets = [3, 0], sizes = [1, 512], strides = [1, 1]} : vector<4x512xf32> to vector<1x512xf32>
    %52 = vector.extract_strided_slice %14 {offsets = [3, 0], sizes = [1, 512], strides = [1, 1]} : vector<4x512xf32> to vector<1x512xf32>
    %53 = arith.minimumf %51, %52 : vector<1x512xf32>
    %54 = arith.addf %50, %53 : vector<1x512xf32>
    %55 = arith.mulf %47, %54 : vector<1x512xf32>
    %56 = arith.addf %33, %40 : vector<1x512xf32>
    %57 = arith.subf %56, %55 : vector<1x512xf32>
    %58 = arith.divf %55, %57 : vector<1x512xf32>
    %cst_7 = arith.constant 1.000000e+00 : f32
    %59 = vector.broadcast %cst_7 : f32 to vector<1x512xf32>
    %60 = arith.select %21, %58, %59 : vector<1x512xi1>, vector<1x512xf32>
    %c0_8 = arith.constant 0 : index
    %c0_9 = arith.constant 0 : index
    %61 = vector.load %arg6[%c0_8, %c0_9] : memref<1x512xf32, #tpu.memory_space<vmem>>, vector<1x512xf32>
    %62 = math.log %60 : vector<1x512xf32>
    %cst_10 = arith.constant 0.000000e+00 : f32
    %63 = vector.broadcast %cst_10 : f32 to vector<1x512xf32>
    %64 = arith.subf %63, %62 : vector<1x512xf32>
    %65 = arith.addf %61, %64 : vector<1x512xf32>
    %c0_11 = arith.constant 0 : index
    %c0_12 = arith.constant 0 : index
    %66 = vector.load %arg6[%c0_11, %c0_12] : memref<1x512xf32, #tpu.memory_space<vmem>>, vector<1x512xf32>
    tpu.vector_store %arg6[%c0_11, %c0_12], %65 {strides = array<i32>} : memref<1x512xf32, #tpu.memory_space<vmem>>, vector<1x512xf32>,
    %c0_13 = arith.constant 0 : index
    %c0_14 = arith.constant 0 : index
    %67 = vector.load %arg3[%c0_13, %c0_14] : memref<8x512xf32, #tpu.memory_space<vmem>>, vector<8x512xf32>
    %68 = tpu.iota {dimensions = array<i32: 0>} : vector<8x512xi32>
    %69 = vector.broadcast %18 : vector<1x512xi32> to vector<8x512xi32>
    %70 = arith.cmpi eq, %68, %69 : vector<8x512xi32>
    %71 = arith.extui %70 : vector<8x512xi1> to vector<8x512xi32>
    %72 = arith.sitofp %71 : vector<8x512xi32> to vector<8x512xf32>
    %cst_15 = arith.constant 2.000000e+00 : f32
    %73 = vector.broadcast %cst_15 : f32 to vector<8x512xf32>
    %74 = arith.mulf %73, %72 : vector<8x512xf32>
    %cst_16 = arith.constant 1.000000e+00 : f32
    %75 = vector.broadcast %cst_16 : f32 to vector<8x512xf32>
    %76 = arith.subf %74, %75 : vector<8x512xf32>
    %77 = arith.mulf %76, %67 : vector<8x512xf32>
    %78 = math.absf %77 : vector<8x512xf32>
    %cst_17 = arith.constant 0.000000e+00 : f32
    %79 = vector.broadcast %cst_17 : f32 to vector<8x512xf32>
    %80 = arith.subf %79, %78 : vector<8x512xf32>
    %81 = math.exp %80 : vector<8x512xf32>
    %cst_18 = arith.constant 0.000000e+00 : f32
    %82 = vector.broadcast %cst_18 : f32 to vector<8x512xf32>
    %83 = arith.subf %82, %77 : vector<8x512xf32>
    %cst_19 = arith.constant 0.000000e+00 : f32
    %84 = vector.broadcast %cst_19 : f32 to vector<8x512xf32>
    %85 = arith.maximumf %83, %84 : vector<8x512xf32>
    %86 = math.log1p %81 : vector<8x512xf32>
    %87 = arith.addf %85, %86 : vector<8x512xf32>
    %cst_20 = arith.constant 0.000000e+00 : f32
    %88 = vector.broadcast %cst_20 : f32 to vector<8x512xf32>
    %89 = arith.cmpf oge, %77, %88 : vector<8x512xf32>
    %cst_21 = arith.constant 1.000000e+00 : f32
    %90 = vector.broadcast %cst_21 : f32 to vector<8x512xf32>
    %91 = arith.select %89, %81, %90 : vector<8x512xi1>, vector<8x512xf32>
    %cst_22 = arith.constant 1.000000e+00 : f32
    %92 = vector.broadcast %cst_22 : f32 to vector<8x512xf32>
    %93 = arith.addf %92, %81 : vector<8x512xf32>
    %94 = arith.divf %91, %93 : vector<8x512xf32>
    %cst_23 = arith.constant 2.500000e-01 : f32
    %95 = vector.broadcast %cst_23 : f32 to vector<8x512xf32>
    %96 = arith.mulf %95, %72 : vector<8x512xf32>
    %cst_24 = arith.constant 1.000000e+00 : f32
    %97 = vector.broadcast %cst_24 : f32 to vector<8x512xf32>
    %98 = arith.subf %97, %72 : vector<8x512xf32>
    %cst_25 = arith.constant 7.500000e-01 : f32
    %99 = vector.broadcast %cst_25 : f32 to vector<8x512xf32>
    %100 = arith.mulf %99, %98 : vector<8x512xf32>
    %101 = arith.addf %96, %100 : vector<8x512xf32>
    %102 = arith.mulf %94, %94 : vector<8x512xf32>
    %103 = arith.mulf %101, %102 : vector<8x512xf32>
    %104 = arith.mulf %103, %87 : vector<8x512xf32>
    %c0_26 = arith.constant 0 : index
    %c0_27 = arith.constant 0 : index
    %105 = vector.load %arg8[%c0_26, %c0_27] : memref<8x512xf32, #tpu.memory_space<vmem>>, vector<8x512xf32>
    %cst_28 = arith.constant 0.000000e+00 : f32
    %106 = vector.shape_cast %10 : vector<1x512xi1> to vector<1x512xi1>
    %107 = vector.broadcast %106 : vector<1x512xi1> to vector<8x512xi1>
    %108 = vector.broadcast %cst_28 : f32 to vector<8x512xf32>
    %109 = arith.select %107, %104, %108 : vector<8x512xi1>, vector<8x512xf32>
    %110 = arith.addf %105, %109 : vector<8x512xf32>
    %c0_29 = arith.constant 0 : index
    %c0_30 = arith.constant 0 : index
    %111 = vector.load %arg8[%c0_29, %c0_30] : memref<8x512xf32, #tpu.memory_space<vmem>>, vector<8x512xf32>
    tpu.vector_store %arg8[%c0_29, %c0_30], %110 {strides = array<i32>} : memref<8x512xf32, #tpu.memory_space<vmem>>, vector<8x512xf32>,
    %cst_31 = arith.constant 0.000000e+00 : f32
    %112 = vector.broadcast %cst_31 : f32 to vector<1x512xf32>
    %113 = arith.maximumf %15, %112 : vector<1x512xf32>
    %114 = arith.mulf %15, %16 : vector<1x512xf32>
    %115 = arith.subf %113, %114 : vector<1x512xf32>
    %116 = math.absf %15 : vector<1x512xf32>
    %cst_32 = arith.constant 0.000000e+00 : f32
    %117 = vector.broadcast %cst_32 : f32 to vector<1x512xf32>
    %118 = arith.subf %117, %116 : vector<1x512xf32>
    %119 = math.exp %118 : vector<1x512xf32>
    %120 = math.log1p %119 : vector<1x512xf32>
    %121 = arith.addf %115, %120 : vector<1x512xf32>
    %c0_33 = arith.constant 0 : index
    %c0_34 = arith.constant 0 : index
    %122 = vector.load %arg7[%c0_33, %c0_34] : memref<1x512xf32, #tpu.memory_space<vmem>>, vector<1x512xf32>
    %cst_35 = arith.constant 0.000000e+00 : f32
    %123 = vector.broadcast %cst_35 : f32 to vector<1x512xf32>
    %124 = arith.select %21, %121, %123 : vector<1x512xi1>, vector<1x512xf32>
    %125 = arith.addf %122, %124 : vector<1x512xf32>
    %c0_36 = arith.constant 0 : index
    %c0_37 = arith.constant 0 : index
    %126 = vector.load %arg7[%c0_36, %c0_37] : memref<1x512xf32, #tpu.memory_space<vmem>>, vector<1x512xf32>
    tpu.vector_store %arg7[%c0_36, %c0_37], %125 {strides = array<i32>} : memref<1x512xf32, #tpu.memory_space<vmem>>, vector<1x512xf32>,
    %c0_i32_38 = arith.constant 0 : i32
    %127 = arith.cmpi eq, %arg1, %c0_i32_38 : i32
    %128 = arith.extui %127 : i1 to i32
    %c0_i32_39 = arith.constant 0 : i32
    %129 = arith.cmpi ne, %128, %c0_i32_39 : i32
    scf.if %129 {
      %c0_40 = arith.constant 0 : index
      %c0_41 = arith.constant 0 : index
      %130 = vector.load %arg5[%c0_40, %c0_41] : memref<1x512xf32, #tpu.memory_space<vmem>>, vector<1x512xf32>
      %131 = vector.shape_cast %130 : vector<1x512xf32> to vector<1x1x512xf32>
      %cst_42 = arith.constant dense<0.000000e+00> : vector<1xf32>
      %132 = vector.multi_reduction <add>, %131, %cst_42 [1, 2] : vector<1x1x512xf32> to vector<1xf32>
      %133 = vector.shape_cast %132 : vector<1xf32> to vector<1x1x1xf32>
      %134 = vector.extract %133[0, 0, 0] : f32 from vector<1x1x1xf32>
      %135 = vector.broadcast %134 : f32 to vector<1x1xf32>
      %c0_43 = arith.constant 0 : index
      %c0_44 = arith.constant 0 : index
      %136 = vector.load %arg6[%c0_43, %c0_44] : memref<1x512xf32, #tpu.memory_space<vmem>>, vector<1x512xf32>
      %137 = vector.shape_cast %136 : vector<1x512xf32> to vector<1x1x512xf32>
      %cst_45 = arith.constant dense<0.000000e+00> : vector<1xf32>
      %138 = vector.multi_reduction <add>, %137, %cst_45 [1, 2] : vector<1x1x512xf32> to vector<1xf32>
      %139 = vector.shape_cast %138 : vector<1xf32> to vector<1x1x1xf32>
      %140 = vector.extract %139[0, 0, 0] : f32 from vector<1x1x1xf32>
      %141 = vector.broadcast %140 : f32 to vector<1x1xf32>
      %c0_46 = arith.constant 0 : index
      %c0_47 = arith.constant 0 : index
      %142 = vector.load %arg8[%c0_46, %c0_47] : memref<8x512xf32, #tpu.memory_space<vmem>>, vector<8x512xf32>
      %143 = vector.shape_cast %142 : vector<8x512xf32> to vector<1x8x512xf32>
      %cst_48 = arith.constant dense<0.000000e+00> : vector<1xf32>
      %144 = vector.multi_reduction <add>, %143, %cst_48 [1, 2] : vector<1x8x512xf32> to vector<1xf32>
      %145 = vector.shape_cast %144 : vector<1xf32> to vector<1x1x1xf32>
      %146 = vector.extract %145[0, 0, 0] : f32 from vector<1x1x1xf32>
      %147 = vector.broadcast %146 : f32 to vector<1x1xf32>
      %c0_49 = arith.constant 0 : index
      %c0_50 = arith.constant 0 : index
      %148 = vector.load %arg7[%c0_49, %c0_50] : memref<1x512xf32, #tpu.memory_space<vmem>>, vector<1x512xf32>
      %149 = vector.shape_cast %148 : vector<1x512xf32> to vector<1x1x512xf32>
      %cst_51 = arith.constant dense<0.000000e+00> : vector<1xf32>
      %150 = vector.multi_reduction <add>, %149, %cst_51 [1, 2] : vector<1x1x512xf32> to vector<1xf32>
      %151 = vector.shape_cast %150 : vector<1xf32> to vector<1x1x1xf32>
      %152 = vector.extract %151[0, 0, 0] : f32 from vector<1x1x1xf32>
      %153 = vector.broadcast %152 : f32 to vector<1x1xf32>
      %154 = tpu.concatenate %135, %141, %147, %153 in 1 : vector<1x1xf32>, vector<1x1xf32>, vector<1x1xf32>, vector<1x1xf32> -> vector<1x4xf32>
      %155 = vector.shape_cast %154 : vector<1x4xf32> to vector<1x1x4xf32>
      %c0_52 = arith.constant 0 : index
      %c0_53 = arith.constant 0 : index
      %c0_54 = arith.constant 0 : index
      %156 = vector.load %arg4[%c0_52, %c0_53, %c0_54] : memref<1x1x4xf32, #tpu.memory_space<vmem>>, vector<1x1x4xf32>
      tpu.vector_store %arg4[%c0_52, %c0_53, %c0_54], %155 {strides = array<i32>} : memref<1x1x4xf32, #tpu.memory_space<vmem>>, vector<1x1x4xf32>,
    } else {
    }
    return
  }
  func.func @transform_0(%arg0: i32, %arg1: i32) -> (i32, i32) {
    %c1_i32 = arith.constant 1 : i32
    %0 = arith.muli %arg0, %c1_i32 : i32
    %1 = arith.addi %0, %arg1 : i32
    %c0_i32 = arith.constant 0 : i32
    %c0_i32_0 = arith.constant 0 : i32
    return %c0_i32, %1 : i32, i32
  }
  func.func @transform_1(%arg0: i32, %arg1: i32) -> (i32, i32) {
    %c1_i32 = arith.constant 1 : i32
    %0 = arith.muli %arg0, %c1_i32 : i32
    %1 = arith.addi %0, %arg1 : i32
    %c0_i32 = arith.constant 0 : i32
    %c0_i32_0 = arith.constant 0 : i32
    return %c0_i32, %1 : i32, i32
  }
  func.func @transform_2(%arg0: i32, %arg1: i32) -> (i32, i32, i32) {
    %c0_i32 = arith.constant 0 : i32
    %c0_i32_0 = arith.constant 0 : i32
    %c0_i32_1 = arith.constant 0 : i32
    return %arg0, %c0_i32, %c0_i32_0 : i32, i32, i32
  }
}

</mosaic_0001>

<bundles_post_ra>
// kernel: fcos_loss.1
= control target key start
LH: loop header
LB: loop body
LE: loop exit
PB: predicated region body
PF: predicated region fallthrough
CT: control target
= control target key end

     0   :  { %s1267_s9 = smov 0   ;;  %s1269_s10 = smov 0   ;;  %s1900_s0 = inlined_call_operand.vmem [shape: f32[11,1024], index: 0, kind: input, shape index: {}]   ;;  %s1901_s1 = inlined_call_operand.vmem [shape: f32[8,1024], index: 1, kind: input, shape index: {}]   ;;  %s1902_s2 = inlined_call_operand.vmem [shape: f32[2,1,4], index: 2, kind: output, shape index: {}]  }
   0x1   :  { %s1271_s11 = smov 0   ;;  %s1273_s12 = smov 0  }
   0x2   :  { %s1275_s13 = smov 0  }
   0x3 LB: > { %s24_s14 = sadd.s32 1, %s1245_s12  ;;  %p40_p1 = scmp.ne.s32.totalorder %s1237_s10, %s1233_s9  ;;  %s1249_s13 = sphi %s1275_s13, %s12_s13   ;;  %s1245_s12 = sphi %s1273_s12, %s1987_s12   ;;  %s1241_s11 = sphi %s1271_s11, %s1986_s11   ;;  %s1237_s10 = sphi %s1269_s10, %s1985_s10   ;;  %s1233_s9 = sphi %s1267_s9, %s1984_s9  }
   0x4   : > { %p26_p0 = scmp.ge.s32.totalorder %s24_s14, 2  ;;  %p41_p2 = scmp.eq.s32.totalorder %s1249_s13, 0 }
   0x5   : > { %s33_s16 = sadd.s32 1, %s1237_s10  ;;  %p1054_p5 = scmp.ge.s32.totalorder %s1249_s13, 2 }
   0x6   : > { %s1989_s14 = smov (%p26_p0, %s24_s14), 0  ;;  %p42_p3 = por %p41_p2, %p40_p1 }
   0x7   : > { %s30_s15 = ssub.s32 %s1245_s12, %s1989_s14  ;;  %120 = sbr.rel (%p1054_p5) target bundleno = 24 (0x18), region = 16 }
   0x8   : > { %p31_p4 = scmp.eq.s32.totalorder %s30_s15, 0 }
   0xa   : > { %s1302_s17 = scalar_select %p31_p4, %s1237_s10, %s33_s16  }
   0xc   : > { %123 = sbr.rel (!%p42_p3) target bundleno = 24 (0x18), region = 20  ;;  %s125_s18 = sand.u32 (%p42_p3), 1, %s1237_s10  }
   0xd   : > { %s1077_s19 = sshll.u32 (%p42_p3), %s1245_s12, 5  ;;  %s1055_s20 = sshll.u32 (%p42_p3), %s125_s18, 6 }
   0xe   : > { %s131_s23 = scalar_lea.vmem (%p42_p3), %s1900_s0, %s1077_s19  ;;  %s127_s24 = scalar_lea.vmem (%p42_p3), [#allocation6], %s1055_s20 }
   0xf   : > { %v144_v0 = vld [vmem:[%s131_s23] sm:$0xff] (%p42_p3)  ;;  %v146_v1 = vld [vmem:[%s131_s23 + $0x8] sm:$0xff] (%p42_p3)  ;;  %v148_v2 = vld [vmem:[%s131_s23 + $0x10] sm:$0xff] (%p42_p3) }
  0x10   : > { %145 = vst [vmem:[%s127_s24] sm:$0xff] (%p42_p3), %v144_v0  ;;  %v150_v3 = vld [vmem:[%s131_s23 + $0x18] sm:$0xff] (%p42_p3)  ;;  %v152_v4 = vld [vmem:[%s131_s23 + $0x40] sm:$0xff] (%p42_p3)  ;;  %v154_v5 = vld [vmem:[%s131_s23 + $0x48] sm:$0xff] (%p42_p3) }
  0x11   : > { %147 = vst [vmem:[%s127_s24 + $0x8] sm:$0xff] %v146_v1  ;;  %v156_v6 = vld [vmem:[%s131_s23 + $0x50] sm:$0xff]  ;;  %v158_v7 = vld [vmem:[%s131_s23 + $0x58] sm:$0xff] }
  0x12   : > { %149 = vst [vmem:[%s127_s24 + $0x10] sm:$0xff] %v148_v2 }
  0x13   : > { %151 = vst [vmem:[%s127_s24 + $0x18] sm:$0xff] %v150_v3 }
  0x14   : > { %153 = vst [vmem:[%s127_s24 + $0x20] sm:$0xff] %v152_v4 }
  0x15   : > { %155 = vst [vmem:[%s127_s24 + $0x28] sm:$0xff] %v154_v5 }
  0x16   : > { %157 = vst [vmem:[%s127_s24 + $0x30] sm:$0xff] %v156_v6 }
  0x17   : > { %159 = vst [vmem:[%s127_s24 + $0x38] sm:$0xff] %v158_v7 }
  0x18 PF: > { %p1058_p6 = scmp.ge.s32.totalorder %s1249_s13, 1  ;;  %p175_p7 = scmp.lt.s32.totalorder %s1249_s13, 3 }
  0x1a   : > { %p176_p8 = pnand %p1058_p6, %p175_p7 }
  0x1c   : > { %179 = sbr.rel (%p176_p8) target bundleno = 380 (0x17c), region = 47 }
  0x21   : > { %s182_s25 = sand.u32 1, %s1233_s9   ;;  %v224_v8 = vlaneseq  ;;  %s1062_s26 = sshll.u32 %s1241_s11, 9  ;;  %v1910_v10 = vmov 0  ;;  %v1251_v12 = vmov 0.0  }
  0x22   : > { %s1059_s27 = sshll.u32 %s182_s25, 6  ;;  %v242_v9 = vstv %s1062_s26  ;;  %s1060_s29 = sshll.u32 %s1241_s11, 2 }
  0x23   : > { %vm1314_vm0 = vcmp.lt.s32.totalorder %v224_v8, 512  ;;  %v237_v11 = vand.u32 127, %v224_v8  ;;  %s1321_s28 = scalar_lea.vmem [#allocation6], %s1059_s27  ;;  %v1338_v22 = vshrl.u32 %v224_v8, 7  ;;  %p1355_p9 = scmp.lt.s32.totalorder %s1060_s29, 7 }
  0x24   : > { %v1911_v10 = vsel %vm1314_vm0, 4294967295, %v1910_v10  ;;  %228 = vst.msk [vmem:[#allocation2] sm:$0xf] %vm1314_vm0, %v1251_v12  ;;  %v1324_v13 = vld [vmem:[%s1321_s28 + $0x20] sm:$0x7]  ;;  %v1448_v6 = vld [vmem:[%s1321_s28 + $0x8] sm:$0xff] }
  0x25   : > { %1912 = vst [vmem:[#allocation7_spill] sm:$0xff] %v1911_v10  ;;  %v238_v14 = vadd.s32 128, %v237_v11  ;;  %v239_v15 = vadd.s32 256, %v237_v11  ;;  %v240_v16 = vadd.s32 384, %v237_v11  ;;  %v1327_v17 = vadd.s32 %v242_v9, %v237_v11  ;;  %v1330_v18 = vld [vmem:[%s1321_s28 + $0x28] sm:$0x7] }
  0x26   : > { %v251_v19 = vld [vmem:[%s1321_s28] sm:$0xff]  ;;  %v1334_v20 = vld [vmem:[%s1321_s28 + $0x30] sm:$0x7]  ;;  %vm271_vm1 = vcmp.ne.f32.partialorder %v1324_v13, 0.0  ;;  %vm272_vm2 = vcmp.ne.f32.partialorder %v1330_v18, 0.0  ;;  %vm1078_vm11 = vcmp.lt.s32.totalorder %v1324_v13, 0  ;;  %v1079_v33 = vceil.f32 %v1324_v13 }
  0x27   : > { %v341_v21 = vrot.slane %v251_v19, 2  ;;  %v1340_v23 = vadd.s32 %v242_v9, %v238_v14  ;;  %v1342_v24 = vadd.s32 %v242_v9, %v239_v15  ;;  %v1344_v25 = vadd.s32 %v242_v9, %v240_v16  ;;  %v1348_v26 = vld [vmem:[%s1321_s28 + $0x38] sm:$0x7]  ;;  %229 = vst.msk [vmem:[#allocation3] sm:$0xf] %vm1314_vm0, %v1251_v12  ;;  %s1991_s29 = smov (!%p1355_p9, %s1060_s29), 7 }
  0x28   : > { %vm1907_vm3 = vcmp.lt.s32.totalorder %v1327_v17, 512  ;;  %vm273_vm4 = vcmp.ne.f32.partialorder %v1334_v20, 0.0  ;;  %vm274_vm5 = vcmp.ne.f32.partialorder %v1348_v26, 0.0  ;;  %v259_v28 = vmul.f32 1.442695, %v251_v19  ;;  %s1061_s3 = sshll.u32 %s1991_s29, 3 }
  0x29   : > { %vm1363_vm6 = vmand %vm271_vm1, %vm1907_vm3  ;;  %v349_v29 = vadd.f32 %v341_v21, %v251_v19  ;;  %230 = vst.msk [vmem:[#allocation4] sm:$0xf] %vm1314_vm0, %v1251_v12  ;;  %vm1906_vm7 = vcmp.lt.s32.totalorder %v1340_v23, 512  ;;  %vm1905_vm8 = vcmp.lt.s32.totalorder %v1342_v24, 512  ;;  %vm1904_vm9 = vcmp.lt.s32.totalorder %v1344_v25, 512  ;;  %s1435_s6 = scalar_lea.vmem %s1901_s1, %s1061_s3  ;;  %p217_p10 = scmp.lt.s32.totalorder %s1241_s11, 1 }
  0x2a   : > { %v1063_v30 = vsel %vm1363_vm6, 1.0, %v1251_v12  ;;  %vm1380_vm10 = vmand %vm272_vm2, %vm1906_vm7  ;;  %1147 = vpow2.f32 %v259_v28  ;;  %v1080_v36 = vfloor.f32 %v1324_v13  ;;  %vm1083_vm13 = vcmp.lt.s32.totalorder %v1330_v18, 0  ;;  %v535_v11 = vld [vmem:[%s1435_s6] sm:$0xff] }
  0x2b   : > { %292 = vst [vmem:[#allocation1] sm:$0xff] %v1063_v30  ;;  %v357_v32 = vrot.slane %v349_v29, 1  ;;  %vm1390_vm12 = vmand %vm273_vm4, %vm1905_vm8  ;;  %v1064_v35 = vsel %vm1380_vm10, 1.0, %v1251_v12  ;;  %v1084_v37 = vceil.f32 %v1330_v18  ;;  %v369_v40 = vrot.slane %v251_v19, 4  ;;  %v279_v63 = vld [vmem:[#allocation2] sm:$0xf] }
  0x2c   : > { %vm1410_vm14 = vmand %vm274_vm5, %vm1904_vm9  ;;  %v1065_v39 = vsel %vm1390_vm12, 1.0, %v1251_v12  ;;  %293 = vst [vmem:[#allocation1 + $0x9] sm:$0xff] %v1064_v35  ;;  %v1085_v41 = vfloor.f32 %v1330_v18  ;;  %vm1088_vm15 = vcmp.lt.s32.totalorder %v1334_v20, 0  ;;  %v1081_v43 = vsel %vm1078_vm11, %v1079_v33, %v1080_v36  ;;  %v536_v19 = vld [vmem:[%s1435_s6 + $0x8] sm:$0xff]  ;;  %s1993_s11 = smov (!%p217_p10, %s1241_s11), 1 }
  0x2d   : > { %v1066_v42 = vsel %vm1410_vm14, 1.0, %v1251_v12  ;;  %294 = vst [vmem:[#allocation1 + $0x12] sm:$0xff] %v1065_v39  ;;  %v1089_v44 = vceil.f32 %v1334_v20  ;;  %v1090_v45 = vfloor.f32 %v1334_v20  ;;  %v365_v46 = vmul.f32 %v357_v32, %v349_v29  ;;  %v537_v32 = vld [vmem:[%s1435_s6 + $0x10] sm:$0xff]  ;;  %v1463_v36 = vld [vmem:[%s1321_s28 + $0x10] sm:$0xff]  ;;  %s219_s18 = scalar_lea.vmem %s1902_s2, %s1993_s11 }
  0x2e   : > { %295 = vst [vmem:[#allocation1 + $0x1b] sm:$0xff] %v1066_v42  ;;  %v1082_v47 = vcvt.f32.s32 %v1081_v43  ;;  %v1086_v48 = vsel %vm1083_vm13, %v1084_v37, %v1085_v41  ;;  %vm1093_vm1 = vcmp.lt.s32.totalorder %v1348_v26, 0  ;;  %v1094_v51 = vceil.f32 %v1348_v26  ;;  %v538_v43 = vld [vmem:[%s1435_s6 + $0x18] sm:$0xff] }
  0x2f   : > { %v1087_v49 = vcvt.f32.s32 %v1086_v48  ;;  %v1091_v50 = vsel %vm1088_vm15, %v1089_v44, %v1090_v45  ;;  %v1095_v52 = vfloor.f32 %v1348_v26  ;;  %v417_v60 = vrot.slane %v365_v46, 4 }
  0x30   : > { %v1148_v53 = vpop.eup %1147  ;;  %v1092_v54 = vcvt.f32.s32 %v1091_v50  ;;  %v541_v55 = vperm.slane %v1082_v47, 2  ;;  %v1480_v47 = vld [vmem:[%s1321_s28 + $0x18] sm:$0xff]  ;;  %vm1903_vm13 = vcmask 1040384   ;;  %v263_v50 = vmul.f32 1.442695, %v1463_v36 }
  0x31   : > { %v309_v56 = vrot.slane %v1148_v53, 2  ;;  %v377_v57 = vmin.f32 %v1148_v53, %v369_v40  ;;  %v1096_v58 = vsel %vm1093_vm1, %v1094_v51, %v1095_v52  ;;  %v542_v59 = vperm.slane %v1087_v49, 2 }
  0x32   : > { %v1097_v61 = vcvt.f32.s32 %v1096_v58  ;;  %v543_v62 = vperm.slane %v1092_v54, 2  ;;  %vm545_vm2 = vcmp.eq.s32.totalorder %v1338_v22, %v541_v55  ;;  %v261_v40 = vmul.f32 1.442695, %v1448_v6 }
  0x33   : > { %v317_v0 = vadd.f32 %v1148_v53, %v309_v56  ;;  %v385_v1 = vrot.slane %v377_v57, 2  ;;  %vm546_vm4 = vcmp.eq.s32.totalorder %v1338_v22, %v542_v59  ;;  %v1440_v2 = vsel %vm545_vm2, 1.0, %v1251_v12 }
  0x34   : > { %v544_v3 = vperm.slane %v1097_v61, 2  ;;  %vm547_vm5 = vcmp.eq.s32.totalorder %v1338_v22, %v543_v62  ;;  %v1444_v4 = vsel %vm546_vm4, 1.0, %v1251_v12  ;;  %v557_v5 = vmul.f32 2.0, %v1440_v2 }
  0x35   : > { %v297_v7 = vld [vmem:[#allocation1 + $0x2] ss:$9 sm:$0xff]  ;;  %v325_v8 = vrot.slane %v317_v0, 1  ;;  %v393_v9 = vadd.f32 %v385_v1, %v377_v57  ;;  %v1452_v14 = vsel %vm547_vm5, 1.0, %v1251_v12  ;;  %v558_v15 = vmul.f32 2.0, %v1444_v4 }
  0x36   : > { %v299_v16 = vadd.f32 %v297_v7, %v279_v63  ;;  %vm548_vm11 = vcmp.eq.s32.totalorder %v1338_v22, %v544_v3  ;;  %v559_v21 = vmul.f32 2.0, %v1452_v14  ;;  %v1071_v28 = vadd.f32 -1.0, %v557_v5 }
  0x37   : > { %v333_v29 = vmul.f32 %v325_v8, %v317_v0  ;;  %v401_v30 = vrot.slane %v393_v9, 1  ;;  %v1460_v33 = vsel %vm548_vm11, 1.0, %v1251_v12  ;;  %v1072_v35 = vadd.f32 -1.0, %v558_v15 }
  0x38   : > { %304 = vst.msk [vmem:[#allocation2] sm:$0xf] %vm1314_vm0, %v299_v16  ;;  %v560_v37 = vmul.f32 2.0, %v1460_v33  ;;  %v1073_v22 = vadd.f32 -1.0, %v559_v21  ;;  %v1468_v39 = vmul.f32 %v1071_v28, %v535_v11  ;;  %1149 = vpow2.f32 %v261_v40 }
  0x39   : > { %v1471_v41 = vmul.f32 %v401_v30, %v393_v9  ;;  %v425_v42 = vadd.f32 %v417_v60, %v333_v29  ;;  %v1474_v44 = vmul.f32 %v1072_v35, %v536_v19  ;;  %v1494_v56 = vmul.f32 1.442695, %v1480_v47 }
  0x3a   : > { %v1074_v12 = vadd.f32 -1.0, %v560_v37  ;;  %v1476_v45 = vmul.f32 %v1073_v22, %v537_v32  ;;  %v569_v46 = vand.u32 2147483647, %v1468_v39  ;;  %v585_v54 = vsub.f32 0.0, %v1468_v39 }
  0x3b   : > { %v1483_v48 = vsub.f32 %v425_v42, %v1471_v41  ;;  %v570_v49 = vand.u32 2147483647, %v1474_v44  ;;  %v586_v55 = vsub.f32 0.0, %v1474_v44  ;;  %vm633_vm15 = vcmp.ge.f32.partialorder %v1468_v39, 0.0 }
  0x3c   : > { %v1487_v51 = vmul.f32 %v1074_v12, %v538_v43  ;;  %v571_v52 = vand.u32 2147483647, %v1476_v45  ;;  %v573_v53 = vsub.f32 0.0, %v569_v46  ;;  %v587_v0 = vsub.f32 0.0, %v1476_v45 }
  0x3d   : > { %1151 = vrcp.f32 %v1483_v48  ;;  %v574_v58 = vsub.f32 0.0, %v570_v49  ;;  %v442_v62 = vand.u32 2147483647, %v1483_v48  ;;  %v444_v63 = vand.u32 2147483648, %v1483_v48 }
  0x3e   : > { %v572_v57 = vand.u32 2147483647, %v1487_v51  ;;  %v575_v59 = vsub.f32 0.0, %v571_v52  ;;  %v577_v60 = vmul.f32 1.442695, %v573_v53  ;;  %1153 = vpow2.f32 %v263_v50  ;;  %v1501_v15 = vpop.eup %1149 }
  0x3f   : > { %v870_v61 = vld [vmem:[#allocation2] sm:$0xf]  ;;  %v579_v9 = vmul.f32 1.442695, %v574_v58  ;;  %vm438_vm1 = vweird.f32 %v1483_v48  ;;  %v588_v32 = vsub.f32 0.0, %v1487_v51  ;;  %vm1510_vm2 = vcmp.eq.f32.partialorder %v442_v62, 8.507059e+37 }
  0x40   : > { %v872_v1 = vperm.slane %v870_v61, 0  ;;  %v873_v3 = vperm.slane %v870_v61, 1  ;;  %v874_v5 = vperm.slane %v870_v61, 2  ;;  %v875_v7 = vperm.slane %v870_v61, 3 }
  0x41   : > { %v576_v8 = vsub.f32 0.0, %v572_v57  ;;  %1155 = vpow2.f32 %v577_v60  ;;  %v581_v11 = vmul.f32 1.442695, %v575_v59  ;;  %v445_v43 = vor.u32 1.1754944e-38, %v444_v63 }
  0x42   : > { %v881_v16 = vsel %vm1903_vm13, %v872_v1, 0.0  ;;  %v882_v19 = vsel %vm1903_vm13, %v873_v3, 0.0  ;;  %v884_v21 = vsel %vm1903_vm13, %v874_v5, 0.0  ;;  %1157 = vpow2.f32 %v579_v9 }
  0x43   : > { %v1152_v28 = vpop.eup %1151  ;;  %v883_v29 = vadd.f32 %v882_v19, %v881_v16  ;;  %v583_v30 = vmul.f32 1.442695, %v576_v8  ;;  %v886_v35 = vsel %vm1903_vm13, %v875_v7, 0.0  ;;  %1159 = vpow2.f32 %v581_v11 }
  0x44   : > { %v434_v37 = vmul.f32 %v1152_v28, %v1483_v48  ;;  %v1514_v40 = vpop.eup %1153  ;;  %v1516_v12 = vmax.f32 %v585_v54, 0.0  ;;  %v1518_v46 = vmax.f32 %v586_v55, 0.0  ;;  %vm439_vm4 = vweird.f32 %v1152_v28 }
  0x45   : > { %v885_v42 = vadd.f32 %v884_v21, %v883_v29  ;;  %1161 = vpow2.f32 %v583_v30  ;;  %v1520_v50 = vmax.f32 %v587_v0, 0.0  ;;  %v1522_v57 = vmax.f32 %v588_v32, 0.0  ;;  %vm1533_vm13 = vmor %vm438_vm1, %vm439_vm4 }
  0x46   : > { %v435_v49 = vsub.f32 1.0, %v434_v37  ;;  %vm634_vm5 = vcmp.ge.f32.partialorder %v1474_v44, 0.0  ;;  %vm635_vm11 = vcmp.ge.f32.partialorder %v1476_v45, 0.0  ;;  %v1529_v55 = vmul.f32 0.25, %v1440_v2 }
  0x47   : > { %v1156_v52 = vpop.eup %1155  ;;  %v887_v53 = vadd.f32 %v886_v35, %v885_v42  ;;  %vm636_vm9 = vcmp.ge.f32.partialorder %v1487_v51, 0.0  ;;  %v1539_v63 = vmul.f32 0.25, %v1444_v4  ;;  %v709_v0 = vsub.f32 1.0, %v1440_v2 }
  0x48   : > { %v436_v58 = vmul.f32 %v1152_v28, %v435_v49  ;;  %v1526_v59 = vadd.f32 1.0, %v1156_v52  ;;  %v596_v54 = vmul.f32 -0.5, %v1156_v52  ;;  %v1158_v60 = vpop.eup %1157  ;;  %v599_v62 = vand.u32 2147483647, %v1156_v52 }
  0x49   : > { %888 = vadd.xlane.f32.xlu0 %v887_v53  ;;  %v710_v1 = vsub.f32 1.0, %v1444_v4  ;;  %v1160_v3 = vpop.eup %1159  ;;  %v1546_v48 = vsel %vm633_vm15, %v1156_v52, 1.0  ;;  %v1549_v7 = vmul.f32 0.25, %v1452_v14  ;;  %v1551_v9 = vadd.f32 1.0, %v1158_v60 }
  0x4a   : > { %v437_v5 = vadd.f32 %v1152_v28, %v436_v58  ;;  %1163 = vlog2.f32 %v1526_v59  ;;  %v597_v8 = vadd.f32 1.0, %v596_v54  ;;  %v605_v11 = vmul.f32 -0.5, %v1158_v60 }
  0x4b   : > { %v608_v16 = vand.u32 2147483647, %v1158_v60  ;;  %v1162_v19 = vpop.eup %1161  ;;  %v1555_v29 = vadd.f32 1.0, %v1160_v3  ;;  %v614_v30 = vmul.f32 -0.5, %v1160_v3  ;;  %v617_v32 = vand.u32 2147483647, %v1160_v3 }
  0x4c   : > { %v441_v21 = vsel %vm1533_vm13, %v1152_v28, %v437_v5  ;;  %1165 = vlog2.f32 %v1551_v9  ;;  %v606_v35 = vadd.f32 1.0, %v605_v11  ;;  %v711_v37 = vsub.f32 1.0, %v1452_v14 }
  0x4d   : > { %v446_v39 = vsel %vm1510_vm2, %v445_v43, %v441_v21  ;;  %1167 = vlog2.f32 %v1555_v29  ;;  %v615_v49 = vadd.f32 1.0, %v614_v30  ;;  %v598_v53 = vmul.f32 %v1156_v52, %v597_v8 }
  0x4e   : > { %v1562_v42 = vmul.f32 %v446_v39, %v1471_v41  ;;  %v1566_v58 = vadd.f32 1.0, %v1162_v19  ;;  %v623_v54 = vmul.f32 -0.5, %v1162_v19  ;;  %v626_v61 = vand.u32 2147483647, %v1162_v19 }
  0x4f   : > { %vm1568_vm13 = vcmp.lt.f32.partialorder %v599_v62, 0.0004427343  ;;  %v607_v5 = vmul.f32 %v1158_v60, %v606_v35  ;;  %vm1572_vm15 = vcmp.lt.f32.partialorder %v608_v16, 0.0004427343  ;;  %vm1576_vm1 = vcmp.lt.f32.partialorder %v617_v32, 0.0004427343 }
  0x50   : > { %v1164_v22 = vpop.eup %1163  ;;  %1169 = vlog2.f32 %v1566_v58  ;;  %v624_v21 = vadd.f32 1.0, %v623_v54  ;;  %v616_v30 = vmul.f32 %v1160_v3, %v615_v49  ;;  %v1584_v62 = vsel %vm634_vm5, %v1158_v60, 1.0 }
  0x51   : > { %v595_v8 = vmul.f32 0.6931472, %v1164_v22  ;;  %v1588_v16 = vsel %vm635_vm11, %v1160_v3, 1.0  ;;  %1171 = vrcp.f32 %v1526_v59  ;;  %vm1593_vm2 = vcmp.lt.f32.partialorder %v626_v61, 0.0004427343 }
  0x52   : > { %v1166_v32 = vpop.eup %1165  ;;  %v654_v49 = vand.u32 2147483647, %v1526_v59  ;;  %v656_v44 = vand.u32 2147483648, %v1526_v59  ;;  %v1601_v45 = vsel %vm636_vm9, %v1162_v19, 1.0  ;;  %vm650_vm4 = vweird.f32 %v1526_v59 }
  0x53   : > { %v601_v39 = vsel %vm1568_vm13, %v598_v53, %v595_v8  ;;  %v1168_v60 = vpop.eup %1167  ;;  %v604_v54 = vmul.f32 0.6931472, %v1166_v32  ;;  %1173 = vrcp.f32 %v1551_v9  ;;  %v625_v53 = vmul.f32 %v1162_v19, %v624_v21 }
  0x54   : > { %v613_v3 = vmul.f32 0.6931472, %v1168_v60  ;;  %v1606_v61 = vadd.f32 %v601_v39, %v1516_v12  ;;  %v669_v22 = vand.u32 2147483647, %v1551_v9  ;;  %vm665_vm5 = vweird.f32 %v1551_v9 }
  0x55   : > { %v610_v43 = vsel %vm1572_vm15, %v607_v5, %v604_v54  ;;  %v671_v51 = vand.u32 2147483648, %v1551_v9  ;;  %1175 = vrcp.f32 %v1555_v29  ;;  %vm1616_vm9 = vcmp.eq.f32.partialorder %v654_v49, 8.507059e+37 }
  0x56   : > { %v1170_v8 = vpop.eup %1169  ;;  %v619_v32 = vsel %vm1576_vm1, %v616_v30, %v613_v3  ;;  %v657_v12 = vor.u32 1.1754944e-38, %v656_v44  ;;  %v684_v21 = vand.u32 2147483647, %v1555_v29  ;;  %v1622_v5 = vadd.f32 %v610_v43, %v1518_v46 }
  0x57   : > { %v1172_v39 = vpop.eup %1171  ;;  %v622_v11 = vmul.f32 0.6931472, %v1170_v8  ;;  %v686_v60 = vand.u32 2147483648, %v1555_v29  ;;  %v1627_v54 = vadd.f32 %v619_v32, %v1520_v50  ;;  %vm1630_vm13 = vcmp.eq.f32.partialorder %v669_v22, 8.507059e+37 }
  0x58   : > { %v646_v41 = vmul.f32 %v1172_v39, %v1526_v59  ;;  %1177 = vrcp.f32 %v1566_v58  ;;  %vm651_vm15 = vweird.f32 %v1172_v39  ;;  %v672_v44 = vor.u32 1.1754944e-38, %v671_v51 }
  0x59   : > { %v1174_v49 = vpop.eup %1173  ;;  %v628_v46 = vsel %vm1593_vm2, %v625_v53, %v622_v11  ;;  %v699_v3 = vand.u32 2147483647, %v1566_v58  ;;  %vm1639_vm1 = vcmp.eq.f32.partialorder %v684_v21, 8.507059e+37  ;;  %v687_v22 = vor.u32 1.1754944e-38, %v686_v60  ;;  %vm1654_vm7 = vmor %vm650_vm4, %vm651_vm15 }
  0x5a   : > { %v647_v43 = vsub.f32 1.0, %v646_v41  ;;  %v661_v50 = vmul.f32 %v1174_v49, %v1551_v9  ;;  %v1644_v52 = vadd.f32 %v628_v46, %v1522_v57  ;;  %vm695_vm8 = vweird.f32 %v1566_v58 }
  0x5b   : > { %v1176_v32 = vpop.eup %1175  ;;  %v701_v35 = vand.u32 2147483648, %v1566_v58  ;;  %v713_v53 = vmul.f32 0.75, %v709_v0  ;;  %vm666_vm2 = vweird.f32 %v1174_v49  ;;  %vm1658_vm11 = vcmp.eq.f32.partialorder %v699_v3, 8.507059e+37 }
  0x5c   : > { %v648_v51 = vmul.f32 %v1172_v39, %v647_v43  ;;  %v662_v11 = vsub.f32 1.0, %v661_v50  ;;  %v676_v21 = vmul.f32 %v1176_v32, %v1555_v29  ;;  %vm681_vm3 = vweird.f32 %v1176_v32  ;;  %vm1669_vm4 = vmor %vm665_vm5, %vm666_vm2 }
  0x5d   : > { %v702_v41 = vor.u32 1.1754944e-38, %v701_v35  ;;  %v708_v2 = vmul.f32 0.25, %v1460_v33  ;;  %v714_v0 = vmul.f32 0.75, %v710_v1  ;;  %v715_v59 = vmul.f32 0.75, %v711_v37 }
  0x5e   : > { %v1178_v46 = vpop.eup %1177  ;;  %v649_v43 = vadd.f32 %v1172_v39, %v648_v51  ;;  %v663_v50 = vmul.f32 %v1174_v49, %v662_v11  ;;  %v677_v28 = vsub.f32 1.0, %v676_v21  ;;  %v1946_v10 = vsub.f32 1.0, %v1460_v33 }
  0x5f   : > { %v691_v35 = vmul.f32 %v1178_v46, %v1566_v58  ;;  %vm696_vm15 = vweird.f32 %v1178_v46  ;;  %v717_v1 = vadd.f32 %v713_v53, %v1529_v55  ;;  %v718_v37 = vadd.f32 %v714_v0, %v1539_v63 }
  0x60   : > { %v716_v4 = vmul.f32 0.75, %v1946_v10  ;;  %v653_v51 = vsel %vm1654_vm7, %v1172_v39, %v649_v43  ;;  %v664_v11 = vadd.f32 %v1174_v49, %v663_v50  ;;  %v678_v14 = vmul.f32 %v1176_v32, %v677_v28 }
  0x61   : > { %v658_v9 = vsel %vm1616_vm9, %v657_v12, %v653_v51  ;;  %vm1947_vm5 = vweird.f32 %v1555_v29  ;;  %v692_v10 = vsub.f32 1.0, %v691_v35  ;;  %1179 = vpow2.f32 %v1494_v56 }
  0x62   : > { %vm1685_vm2 = vmor %vm1947_vm5, %vm681_vm3  ;;  %v310_v33 = vrot.slane %v1501_v15, 2  ;;  %v659_v55 = vmul.f32 %v658_v9, %v1546_v48  ;;  %v668_v63 = vsel %vm1669_vm4, %v1174_v49, %v664_v11  ;;  %v679_v28 = vadd.f32 %v1176_v32, %v678_v14 }
  0x63   : > { %v311_v19 = vrot.slane %v1514_v40, 2  ;;  %v673_v29 = vsel %vm1630_vm13, %v672_v44, %v668_v63  ;;  %v693_v12 = vmul.f32 %v1178_v46, %v692_v10  ;;  %v342_v53 = vrot.slane %v1448_v6, 2  ;;  %vm1705_vm3 = vmor %vm695_vm8, %vm696_vm15 }
  0x64   : > { %v318_v39 = vadd.f32 %v1501_v15, %v310_v33  ;;  %v674_v56 = vmul.f32 %v673_v29, %v1584_v62  ;;  %v683_v60 = vsel %vm1685_vm2, %v1176_v32, %v679_v28  ;;  %v719_v30 = vadd.f32 %v715_v59, %v1549_v7 }
  0x65   : > { %v721_v49 = vmul.f32 %v659_v55, %v659_v55  ;;  %v688_v44 = vsel %vm1639_vm1, %v687_v22, %v683_v60  ;;  %v694_v0 = vadd.f32 %v1178_v46, %v693_v12  ;;  %v319_v43 = vadd.f32 %v1514_v40, %v311_v19 }
  0x66   : > { %v343_v62 = vrot.slane %v1463_v36, 2  ;;  %v689_v32 = vmul.f32 %v688_v44, %v1588_v16  ;;  %v720_v50 = vadd.f32 %v716_v4, %v708_v2  ;;  %v722_v3 = vmul.f32 %v674_v56, %v674_v56 }
  0x67   : > { %v725_v58 = vmul.f32 %v721_v49, %v717_v1  ;;  %v1180_v35 = vpop.eup %1179  ;;  %v698_v51 = vsel %vm1705_vm3, %v1178_v46, %v694_v0  ;;  %v326_v11 = vrot.slane %v318_v39, 1  ;;  %v344_v7 = vrot.slane %v1480_v47, 2 }
  0x68   : > { %v350_v8 = vadd.f32 %v342_v53, %v1448_v6  ;;  %v703_v22 = vsel %vm1658_vm11, %v702_v41, %v698_v51  ;;  %v723_v59 = vmul.f32 %v689_v32, %v689_v32  ;;  %v726_v14 = vmul.f32 %v722_v3, %v718_v37 }
  0x69   : > { %v729_v9 = vmul.f32 %v725_v58, %v1606_v61  ;;  %v704_v16 = vmul.f32 %v703_v22, %v1601_v45  ;;  %v312_v2 = vrot.slane %v1180_v35, 2  ;;  %v327_v4 = vrot.slane %v319_v43, 1 }
  0x6a   : > { %v351_v1 = vadd.f32 %v343_v62, %v1463_v36  ;;  %v727_v21 = vmul.f32 %v723_v59, %v719_v30  ;;  %v730_v46 = vmul.f32 %v726_v14, %v1622_v5  ;;  %vm1952_vm7 = vcmp.lt.s32.totalorder %v1327_v17, 512 }
  0x6b   : > { %v745_v10 = vsel %vm1952_vm7, %v729_v9, 0.0  ;;  %v352_v33 = vadd.f32 %v344_v7, %v1480_v47  ;;  %v724_v57 = vmul.f32 %v704_v16, %v704_v16  ;;  %v320_v41 = vadd.f32 %v1180_v35, %v312_v2 }
  0x6c   : > { %v358_v55 = vrot.slane %v350_v8, 1  ;;  %v359_v37 = vrot.slane %v351_v1, 1  ;;  %v731_v61 = vmul.f32 %v727_v21, %v1627_v54  ;;  %vm1953_vm8 = vcmp.lt.s32.totalorder %v1340_v23, 512 }
  0x6d   : > { %v746_v45 = vsel %vm1953_vm8, %v730_v46, 0.0  ;;  %v360_v63 = vrot.slane %v352_v33, 1  ;;  %v370_v28 = vrot.slane %v1448_v6, 4  ;;  %v1954_v19 = vrot.slane %v1562_v42, 6 }
  0x6e   : > { %v728_v5 = vmul.f32 %v724_v57, %v720_v50  ;;  %v929_v29 = vadd.f32 %v746_v45, %v745_v10  ;;  %v366_v12 = vmul.f32 %v358_v55, %v350_v8  ;;  %vm1955_vm9 = vcmp.lt.s32.totalorder %v1342_v24, 512 }
  0x6f   : > { %v505_v17 = vsel %vm1363_vm6, %v1954_v19, 1.0  ;;  %v747_v53 = vsel %vm1955_vm9, %v731_v61, 0.0  ;;  %v328_v56 = vrot.slane %v320_v41, 1  ;;  %v367_v60 = vmul.f32 %v359_v37, %v351_v1 }
  0x70   : > { %v371_v54 = vrot.slane %v1463_v36, 4  ;;  %v732_v23 = vmul.f32 %v728_v5, %v1644_v52  ;;  %v930_v48 = vadd.f32 %v929_v29, %v747_v53  ;;  %v368_v30 = vmul.f32 %v360_v63, %v352_v33 }
  0x71   : > { %v372_v6 = vrot.slane %v1480_v47, 4  ;;  %v334_v42 = vmul.f32 %v326_v11, %v318_v39  ;;  %v335_v49 = vmul.f32 %v327_v4, %v319_v43  ;;  %v378_v44 = vmin.f32 %v1501_v15, %v370_v28 }
  0x72   : > { %v379_v0 = vmin.f32 %v1514_v40, %v371_v54  ;;  %vm1956_vm11 = vcmp.lt.s32.totalorder %v1344_v25, 512  ;;  %v418_v32 = vrot.slane %v366_v12, 4  ;;  %v781_v50 = vand.u32 2147483647, %v1324_v13 }
  0x73   : > { %v748_v24 = vsel %vm1956_vm11, %v732_v23, 0.0  ;;  %v380_v62 = vmin.f32 %v1180_v35, %v372_v6  ;;  %v386_v3 = vrot.slane %v378_v44, 2  ;;  %v419_v58 = vrot.slane %v367_v60, 4 }
  0x74   : > { %v931_v36 = vadd.f32 %v930_v48, %v748_v24  ;;  %v387_v52 = vrot.slane %v379_v0, 2  ;;  %v336_v51 = vmul.f32 %v328_v56, %v320_v41  ;;  %v420_v47 = vrot.slane %v368_v30, 4 }
  0x75   : > { %v388_v7 = vrot.slane %v380_v62, 2  ;;  %1181 = vlog2.f32 %v505_v17  ;;  %v394_v39 = vadd.f32 %v386_v3, %v378_v44  ;;  %v782_v40 = vand.u32 2147483647, %v1330_v18 }
  0x76   : > { %932 = vadd.xlane.f32.xlu1 %v931_v36  ;;  %v395_v15 = vadd.f32 %v387_v52, %v379_v0  ;;  %v426_v25 = vadd.f32 %v418_v32, %v334_v42  ;;  %v785_v11 = vsub.f32 0.0, %v781_v50  ;;  %v427_v22 = vadd.f32 %v419_v58, %v335_v49 }
  0x77   : > { %v396_v43 = vadd.f32 %v388_v7, %v380_v62  ;;  %v402_v35 = vrot.slane %v394_v39, 1  ;;  %v783_v59 = vand.u32 2147483647, %v1334_v20  ;;  %v428_v9 = vadd.f32 %v420_v47, %v336_v51 }
  0x78   : > { %v403_v8 = vrot.slane %v395_v15, 1  ;;  %v789_v16 = vmul.f32 1.442695, %v785_v11  ;;  %v786_v1 = vsub.f32 0.0, %v782_v40  ;;  %v784_v57 = vand.u32 2147483647, %v1348_v26 }
  0x79   : > { %v404_v14 = vrot.slane %v396_v43, 1  ;;  %v1748_v2 = vmul.f32 %v402_v35, %v394_v39  ;;  %v787_v41 = vsub.f32 0.0, %v783_v59  ;;  %v757_v47 = vmax.f32 %v1324_v13, 0.0 }
  0x7a   : > { %v1750_v4 = vmul.f32 %v403_v8, %v395_v15  ;;  %1183 = vpow2.f32 %v789_v16  ;;  %v791_v61 = vmul.f32 1.442695, %v786_v1  ;;  %v788_v45 = vsub.f32 0.0, %v784_v57 }
  0x7b   : > { %v1182_v21 = vpop.eup %1181  ;;  %v1752_v46 = vmul.f32 %v404_v14, %v396_v43  ;;  %v430_v10 = vsub.f32 %v426_v25, %v1748_v2  ;;  %v793_v63 = vmul.f32 1.442695, %v787_v41  ;;  %v758_v43 = vmax.f32 %v1330_v18, 0.0 }
  0x7c   : > { %v431_v33 = vsub.f32 %v427_v22, %v1750_v4  ;;  %v511_v37 = vmul.f32 0.6931472, %v1182_v21  ;;  %v795_v53 = vmul.f32 1.442695, %v788_v45  ;;  %v759_v59 = vmax.f32 %v1334_v20, 0.0 }
  0x7d   : > { %v432_v55 = vsub.f32 %v428_v9, %v1752_v46  ;;  %1185 = vrcp.f32 %v430_v10  ;;  %v457_v28 = vand.u32 2147483647, %v430_v10  ;;  %v459_v19 = vand.u32 2147483648, %v430_v10 }
  0x7e   : > { %1187 = vrcp.f32 %v431_v33  ;;  %v518_v17 = vsub.f32 0.0, %v511_v37  ;;  %v472_v29 = vand.u32 2147483647, %v431_v33  ;;  %vm453_vm13 = vweird.f32 %v430_v10 }
  0x7f   : > { %1189 = vrcp.f32 %v432_v55  ;;  %vm468_vm1 = vweird.f32 %v431_v33  ;;  %v474_v54 = vand.u32 2147483648, %v431_v33  ;;  %vm1760_vm4 = vcmp.eq.f32.partialorder %v457_v28, 8.507059e+37 }
  0x80   : > { %1191 = vpow2.f32 %v791_v61  ;;  %v1758_v5 = vpop.eup %1183  ;;  %526 = vst [vmem:[#allocation1] sm:$0xff] %v518_v17  ;;  %v460_v30 = vor.u32 1.1754944e-38, %v459_v19  ;;  %vm483_vm15 = vweird.f32 %v432_v55  ;;  %vm1764_vm2 = vcmp.eq.f32.partialorder %v472_v29, 8.507059e+37 }
  0x81   : > { %1193 = vpow2.f32 %v793_v63  ;;  %v487_v62 = vand.u32 2147483647, %v432_v55  ;;  %v489_v32 = vand.u32 2147483648, %v432_v55  ;;  %v797_v3 = vadd.f32 1.0, %v1758_v5 }
  0x82   : > { %v475_v7 = vor.u32 1.1754944e-38, %v474_v54  ;;  %1195 = vpow2.f32 %v795_v53  ;;  %v765_v16 = vrot.slane %v1324_v13, 1  ;;  %v766_v63 = vrot.slane %v1330_v18, 1 }
  0x83   : > { %v1186_v12 = vpop.eup %1185  ;;  %v490_v22 = vor.u32 1.1754944e-38, %v489_v32  ;;  %1197 = vlog2.f32 %v797_v3  ;;  %v767_v17 = vrot.slane %v1334_v20, 1  ;;  %v803_v53 = vand.u32 2147483647, %v1758_v5 }
  0x84   : > { %v1188_v56 = vpop.eup %1187  ;;  %v449_v60 = vmul.f32 %v1186_v12, %v430_v10  ;;  %vm454_vm5 = vweird.f32 %v1186_v12  ;;  %v800_v10 = vmul.f32 -0.5, %v1758_v5 }
  0x85   : > { %v1190_v23 = vpop.eup %1189  ;;  %v464_v6 = vmul.f32 %v1188_v56, %v431_v33  ;;  %vm469_vm3 = vweird.f32 %v1188_v56  ;;  %vm1774_vm8 = vmor %vm453_vm13, %vm454_vm5  ;;  %vm1791_vm13 = vcmp.eq.f32.partialorder %v487_v62, 8.507059e+37  ;;  %v774_v62 = vmul.f32 %v766_v63, %v1330_v18 }
  0x86   : > { %v450_v42 = vsub.f32 1.0, %v449_v60  ;;  %v479_v44 = vmul.f32 %v1190_v23, %v432_v55  ;;  %v1768_v0 = vpop.eup %1191  ;;  %vm484_vm7 = vweird.f32 %v1190_v23  ;;  %vm1780_vm9 = vmor %vm468_vm1, %vm469_vm3  ;;  %v775_v32 = vmul.f32 %v767_v17, %v1334_v20 }
  0x87   : > { %v465_v24 = vsub.f32 1.0, %v464_v6  ;;  %v1771_v52 = vpop.eup %1193  ;;  %v806_v25 = vadd.f32 1.0, %v1768_v0  ;;  %vm1787_vm11 = vmor %vm483_vm15, %vm484_vm7  ;;  %v809_v28 = vmul.f32 -0.5, %v1768_v0  ;;  %vm1832_vm1 = vcmp.lt.f32.partialorder %v803_v53, 0.0004427343 }
  0x88   : > { %v451_v50 = vmul.f32 %v1186_v12, %v450_v42  ;;  %v480_v36 = vsub.f32 1.0, %v479_v44  ;;  %v815_v33 = vadd.f32 1.0, %v1771_v52  ;;  %v1196_v37 = vpop.eup %1195  ;;  %v773_v44 = vmul.f32 %v765_v16, %v1324_v13 }
  0x89   : > { %v466_v51 = vmul.f32 %v1188_v56, %v465_v24  ;;  %1199 = vlog2.f32 %v806_v25  ;;  %v824_v48 = vadd.f32 1.0, %v1196_v37  ;;  %v827_v6 = vmul.f32 -0.5, %v1196_v37 }
  0x8a   : > { %v452_v39 = vadd.f32 %v1186_v12, %v451_v50  ;;  %v481_v40 = vmul.f32 %v1190_v23, %v480_v36  ;;  %1201 = vlog2.f32 %v815_v33  ;;  %v812_v24 = vand.u32 2147483647, %v1768_v0 }
  0x8b   : > { %v467_v11 = vadd.f32 %v1188_v56, %v466_v51  ;;  %v821_v51 = vand.u32 2147483647, %v1771_v52  ;;  %v760_v25 = vmax.f32 %v1348_v26, 0.0  ;;  %v779_v13 = vsub.f32 %v759_v59, %v775_v32 }
  0x8c   : > { %v456_v14 = vsel %vm1774_vm8, %v1186_v12, %v452_v39  ;;  %v482_v9 = vadd.f32 %v1190_v23, %v481_v40  ;;  %v768_v12 = vrot.slane %v1348_v26, 1  ;;  %v828_v40 = vadd.f32 1.0, %v827_v6 }
  0x8d   : > { %v461_v1 = vsel %vm1760_vm4, %v460_v30, %v456_v14  ;;  %v471_v21 = vsel %vm1780_vm9, %v1188_v56, %v467_v11  ;;  %v1198_v56 = vpop.eup %1197  ;;  %v810_v30 = vadd.f32 1.0, %v809_v28  ;;  %vm1839_vm4 = vcmp.lt.f32.partialorder %v812_v24, 0.0004427343 }
  0x8e   : > { %v462_v57 = vmul.f32 %v461_v1, %v1748_v2  ;;  %v476_v41 = vsel %vm1764_vm2, %v475_v7, %v471_v21  ;;  %v486_v55 = vsel %vm1787_vm11, %v1190_v23, %v482_v9  ;;  %v801_v23 = vadd.f32 1.0, %v800_v10 }
  0x8f   : > { %v477_v61 = vmul.f32 %v476_v41, %v1750_v4  ;;  %v491_v45 = vsel %vm1791_vm13, %v490_v22, %v486_v55  ;;  %v818_v4 = vmul.f32 -0.5, %v1771_v52  ;;  %v1200_v42 = vpop.eup %1199  ;;  %v799_v3 = vmul.f32 0.6931472, %v1198_v56 }
  0x90   : > { %v492_v19 = vmul.f32 %v491_v45, %v1752_v46  ;;  %v498_v2 = vrot.slane %v462_v57, 6  ;;  %v1202_v36 = vpop.eup %1201  ;;  %v802_v58 = vmul.f32 %v1758_v5, %v801_v23  ;;  %v808_v39 = vmul.f32 0.6931472, %v1200_v42 }
  0x91   : > { %v499_v29 = vrot.slane %v477_v61, 6  ;;  %v819_v50 = vadd.f32 1.0, %v818_v4  ;;  %v811_v15 = vmul.f32 %v1768_v0, %v810_v30  ;;  %v776_v11 = vmul.f32 %v768_v12, %v1348_v26  ;;  %v509_v12 = vld [vmem:[#allocation3] sm:$0xf] }
  0x92   : > { %v500_v60 = vrot.slane %v492_v19, 6  ;;  %v506_v54 = vsel %vm1380_vm10, %v498_v2, 1.0  ;;  %v830_v5 = vand.u32 2147483647, %v1196_v37  ;;  %v777_v22 = vsub.f32 %v757_v47, %v773_v44 }
  0x93   : > { %v507_v46 = vsel %vm1390_vm12, %v499_v29, 1.0  ;;  %1203 = vlog2.f32 %v506_v54  ;;  %v817_v14 = vmul.f32 0.6931472, %v1202_v36  ;;  %v820_v9 = vmul.f32 %v1771_v52, %v819_v50 }
  0x94   : > { %v508_v49 = vsel %vm1410_vm14, %v500_v60, 1.0  ;;  %1205 = vlog2.f32 %v507_v46  ;;  %v778_v0 = vsub.f32 %v758_v43, %v774_v62  ;;  %v805_v26 = vsel %vm1832_vm1, %v802_v58, %v799_v3 }
  0x95   : > { %1207 = vlog2.f32 %v508_v49  ;;  %vm1850_vm15 = vcmp.lt.f32.partialorder %v821_v51, 0.0004427343  ;;  %v814_v52 = vsel %vm1839_vm4, %v811_v15, %v808_v39  ;;  %v829_v47 = vmul.f32 %v1196_v37, %v828_v40  ;;  %v837_v49 = vld [vmem:[#allocation4] sm:$0xf] }
  0x96   : > { %1209 = vlog2.f32 %v824_v48  ;;  %v780_v43 = vsub.f32 %v760_v25, %v776_v11  ;;  %vm831_vm5 = vcmp.lt.f32.partialorder %v830_v5, 0.0004427343  ;;  %v823_v61 = vsel %vm1850_vm15, %v820_v9, %v817_v14 }
  0x97   : > { %v833_v63 = vadd.f32 %v805_v26, %v777_v22  ;;  %v834_v19 = vadd.f32 %v814_v52, %v778_v0  ;;  %v835_v59 = vadd.f32 %v823_v61, %v779_v13  ;;  %vm971_vm9 = vcmask 15360  }
  0x98   : > { %vm973_vm11 = vcmask 23552   ;;  %vm975_vm13 = vcmask 24576  }
  0x99   : > { %v1204_v8 = vpop.eup %1203  ;;  %v842_v37 = vrot.slane %v833_v63, 6  ;;  %v843_v17 = vrot.slane %v834_v19, 6  ;;  %v844_v29 = vrot.slane %v835_v59, 6 }
  0x9a   : > { %v1206_v16 = vpop.eup %1205  ;;  %v513_v1 = vmul.f32 0.6931472, %v1204_v8 }
  0x9b   : > { %v1208_v10 = vpop.eup %1207  ;;  %v515_v33 = vmul.f32 0.6931472, %v1206_v16  ;;  %v850_v4 = vsel %vm1363_vm6, %v842_v37, 0.0  ;;  %v851_v56 = vsel %vm1380_vm10, %v843_v17, 0.0  ;;  %v852_v23 = vsel %vm1390_vm12, %v844_v29, 0.0 }
  0x9c   : > { %v1210_v57 = vpop.eup %1209  ;;  %v517_v41 = vmul.f32 0.6931472, %v1208_v10  ;;  %v519_v18 = vsub.f32 0.0, %v513_v1  ;;  %vm1976_vm6 = vcmask 1040384  }
  0x9d   : > { %v520_v55 = vsub.f32 0.0, %v515_v33  ;;  %v826_v45 = vmul.f32 0.6931472, %v1210_v57  ;;  %vm1977_vm10 = vmmov %vm1976_vm6 }
  0x9e   : > { %v521_v28 = vsub.f32 0.0, %v517_v41  ;;  %527 = vst [vmem:[#allocation1 + $0x9] sm:$0xff] %v519_v18  ;;  %vm1978_vm12 = vmmov %vm1976_vm6 }
  0x9f   : > { %528 = vst [vmem:[#allocation1 + $0x12] sm:$0xff] %v520_v55  ;;  %v832_v20 = vsel %vm831_vm5, %v829_v47, %v826_v45  ;;  %vm1980_vm2 = vmmov %vm1976_vm6 }
  0xa0   : > { %529 = vst [vmem:[#allocation1 + $0x1b] sm:$0xff] %v521_v28  ;;  %v836_v2 = vadd.f32 %v832_v20, %v780_v43  ;;  %vm1981_vm3 = vmmov %vm1980_vm2 }
  0xa1   : > { %vm1982_vm7 = vmmov %vm1980_vm2 }
  0xa2   : > { %v845_v53 = vrot.slane %v836_v2, 6  ;;  %vm1983_vm8 = vmmov %vm1980_vm2 }
  0xa4   : > { %v853_v48 = vsel %vm1410_vm14, %v845_v53, 0.0  ;;  %vm1979_vm14 = vmmov %vm1976_vm6 }
  0xa7   : > { %v531_v60 = vld [vmem:[#allocation1 + $0x2] ss:$9 sm:$0xff] }
  0xa8   : > { %v533_v54 = vadd.f32 %v531_v60, %v509_v12  ;;  %858 = vst [vmem:[#allocation1] sm:$0xff] %v850_v4 }
  0xa9   : > { %859 = vst [vmem:[#allocation1 + $0x9] sm:$0xff] %v851_v56 }
  0xaa   : > { %534 = vst.msk [vmem:[#allocation3] sm:$0xf] %vm1314_vm0, %v533_v54 }
  0xab   : > { %860 = vst [vmem:[#allocation1 + $0x12] sm:$0xff] %v852_v23 }
  0xac   : > { %861 = vst [vmem:[#allocation1 + $0x1b] sm:$0xff] %v853_v48 }
  0xb1   : > { %v898_v27 = vld [vmem:[#allocation3] sm:$0xf] }
  0xb2   : > { %v900_v30 = vperm.slane %v898_v27, 0  ;;  %v901_v6 = vperm.slane %v898_v27, 1  ;;  %v902_v31 = vperm.slane %v898_v27, 2  ;;  %v903_v42 = vperm.slane %v898_v27, 3 }
  0xb3   : > { %v863_v44 = vld [vmem:[#allocation1 + $0x2] ss:$9 sm:$0xff] }
  0xb4   : > { %v908_v34 = vsel %vm1976_vm6, %v900_v30, 0.0  ;;  %v909_v24 = vsel %vm1977_vm10, %v901_v6, 0.0  ;;  %v911_v38 = vsel %vm1978_vm12, %v902_v31, 0.0  ;;  %v865_v32 = vadd.f32 %v863_v44, %v837_v49 }
  0xb5   : > { %v910_v62 = vadd.f32 %v909_v24, %v908_v34  ;;  %v913_v50 = vsel %vm1979_vm14, %v903_v42, 0.0 }
  0xb6   : > { %866 = vst.msk [vmem:[#allocation4] sm:$0xf] %vm1314_vm0, %v865_v32  ;;  %vm969_vm0 = vcmask 7168  }
  0xb7   : > { %v912_v36 = vadd.f32 %v911_v38, %v910_v62 }
  0xb9   : > { %v914_v3 = vadd.f32 %v913_v50, %v912_v36 }
  0xbb   : > { %915 = vadd.xlane.f32.xlu0 %v914_v3 }
  0xbc   : > { %v889_v14 = vpop.xlane.xlu0 %888 }
  0xbd   : > { %v942_v58 = vld [vmem:[#allocation4] sm:$0xf]  ;;  %v890_v9 = vrot.slane %v889_v14, 4 }
  0xbe   : > { %v944_v51 = vperm.slane %v942_v58, 0  ;;  %v945_v7 = vperm.slane %v942_v58, 1  ;;  %v946_v39 = vperm.slane %v942_v58, 2  ;;  %v947_v15 = vperm.slane %v942_v58, 3 }
  0xbf   : > { %v891_v16 = vadd.f32 %v890_v9, %v889_v14 }
  0xc0   : > { %v952_v40 = vsel %vm1980_vm2, %v944_v51, 0.0  ;;  %v953_v25 = vsel %vm1981_vm3, %v945_v7, 0.0  ;;  %v955_v11 = vsel %vm1982_vm7, %v946_v39, 0.0  ;;  %v957_v5 = vsel %vm1983_vm8, %v947_v15, 0.0 }
  0xc1   : > { %v954_v35 = vadd.f32 %v953_v25, %v952_v40  ;;  %v892_v1 = vrot.slane %v891_v16, 2 }
  0xc3   : > { %v956_v8 = vadd.f32 %v955_v11, %v954_v35  ;;  %v893_v0 = vadd.f32 %v892_v1, %v891_v16 }
  0xc5   : > { %v958_v22 = vadd.f32 %v957_v5, %v956_v8  ;;  %v894_v26 = vrot.slane %v893_v0, 1 }
  0xc7   : > { %959 = vadd.xlane.f32.xlu1 %v958_v22  ;;  %v895_v21 = vadd.f32 %v894_v26, %v893_v0 }
  0xc9   : > { %1098 = vpush %v895_v21 }
  0xe9   : > { %v933_v10 = vpop.xlane.xlu1 %932 }
  0xea   : > { %v934_v33 = vrot.slane %v933_v10, 4 }
  0xec   : > { %v935_v13 = vadd.f32 %v934_v33, %v933_v10 }
  0xee   : > { %v936_v52 = vrot.slane %v935_v13, 2 }
  0xf0   : > { %v937_v18 = vadd.f32 %v936_v52, %v935_v13 }
  0xf2   : > { %v938_v61 = vrot.slane %v937_v18, 1 }
  0xf4   : > { %v939_v28 = vadd.f32 %v938_v61, %v937_v18 }
  0xfa   : > { %s1099_s7 = spop %1098 }
  0xfb   : > { %v897_v53 = vstv %s1099_s7 }
 0x12e   : > { %v916_v47 = vpop.xlane.xlu0 %915 }
 0x12f   : > { %v917_v57 = vrot.slane %v916_v47, 4 }
 0x131   : > { %v918_v41 = vadd.f32 %v917_v57, %v916_v47 }
 0x133   : > { %v919_v43 = vrot.slane %v918_v41, 2 }
 0x135   : > { %v920_v55 = vadd.f32 %v919_v43, %v918_v41 }
 0x137   : > { %v921_v45 = vrot.slane %v920_v55, 1 }
 0x139   : > { %v922_v63 = vadd.f32 %v921_v45, %v920_v55 }
 0x13a   : > { %v960_v19 = vpop.xlane.xlu1 %959 }
 0x13b   : > { %1100 = vpush %v922_v63  ;;  %v961_v20 = vrot.slane %v960_v19, 4 }
 0x13c   : > { %1102 = vpush %v939_v28 }
 0x13d   : > { %v962_v59 = vadd.f32 %v961_v20, %v960_v19 }
 0x13f   : > { %v963_v2 = vrot.slane %v962_v59, 2 }
 0x141   : > { %v964_v37 = vadd.f32 %v963_v2, %v962_v59 }
 0x143   : > { %v965_v17 = vrot.slane %v964_v37, 1 }
 0x145   : > { %v966_v29 = vadd.f32 %v965_v17, %v964_v37 }
 0x147   : > { %1104 = vpush %v966_v29 }
 0x16c   : > { %s1101_s8 = spop %1100 }
 0x16d   : > { %v924_v12 = vstv %s1101_s8  ;;  %s1103_s9 = spop %1102 }
 0x16e   : > { %v970_v4 = vsel %vm969_vm0, %v897_v53, %v924_v12  ;;  %v941_v56 = vstv %s1103_s9 }
 0x16f   : > { %v972_v60 = vsel %vm971_vm9, %v970_v4, %v941_v56 }
 0x178   : > { %s1105_s19 = spop %1104 }
 0x179   : > { %v968_v54 = vstv %s1105_s19 }
 0x17a   : > { %v974_v23 = vsel %vm973_vm11, %v972_v60, %v968_v54 }
 0x17b   : > { %976 = vst.msk [vmem:[%s219_s18] sm:$0x1] %vm975_vm13, %v974_v23 }
 0x17c PF: > { %s12_s13 = sadd.s32 1, %s1249_s13   ;;  %s1984_s9 = smov %s1237_s10 }
 0x17d   : > { %p9_p11 = scmp.ge.s32.totalorder %s12_s13, 4   ;;  %s1985_s10 = smov %s1302_s17 }
 0x17e   : > { %s1986_s11 = smov %s1245_s12  ;;  %s1987_s12 = smov %s1989_s14 }
 0x17f   :  { %11 = sbr.rel (!%p9_p11) target bundleno = 3 (0x3), region = 100 }

</bundles_post_ra>
